<compile_context>
chip_gen: v7x
topology: tpu7x:2x2x1
jax: 0.10.0
libtpu: 0.0.40
codegen_flags: <defaults>
</compile_context>

<pallas_src>
import functools
import math

import jax
import jax.numpy as jnp
from jax import lax
from jax.experimental import pallas as pl
from jax.experimental.pallas import tpu as pltpu


def _round_up(x, m):
    return ((x + m - 1) // m) * m


# ----------------------------------------------------------------------------- kernel


def aacn_kernel(x_ref,
                g_w1, g_b1, g_w2, g_b2, g_w3, g_b3,
                c_w1, c_b1, c_w2, c_b2, c_w3, c_b3,
                out_ref, *, action_dim):
    """Feature-major tile: x_ref is [in_dim, tile_b], out_ref is [out_w, tile_b]."""
    a = x_ref[...]

    def lin(act, w_ref, b_ref):
        w = w_ref[...]                        # [out, in] (f32 or bf16)
        act = act.astype(w.dtype)             # feed MXU matching operand dtypes
        return jnp.dot(w, act, preferred_element_type=jnp.float32) + b_ref[...]

    def lin_tanh(act, w_ref, b_ref):
        return jnp.tanh(lin(act, w_ref, b_ref))

    # shared trunk (g_layer) -> embedding e
    t = lin_tanh(a, g_w1, g_b1)
    t = lin_tanh(t, g_w2, g_b2)
    e = lin_tanh(t, g_w3, g_b3)

    # fused f/h heads (concat layer 1, block-diagonal layers 2 & 3)
    t = lin_tanh(e, c_w1, c_b1)
    t = lin_tanh(t, c_w2, c_b2)
    z = lin(t, c_w3, c_b3)                    # [out_w, tile_b]; h row pre-scaled by 0.5

    # sigmoid(x) = 0.5*(tanh(x/2)+1); the 0.5 input scale is baked into c_w3/c_b3 in the
    # wrapper, so one tanh pass over the slab + one row-select finishes both heads.
    th = jnp.tanh(z)
    row = lax.broadcasted_iota(jnp.int32, (th.shape[0], 1), 0)
    is_h = row == action_dim
    out_ref[...] = jnp.where(is_h, 0.5 * th + 0.5, th).astype(out_ref.dtype)


# ----------------------------------------------------------------------------- wrapper


def _block_diag(a, b):
    top = jnp.concatenate([a, jnp.zeros((a.shape[0], b.shape[1]), a.dtype)], axis=1)
    bot = jnp.concatenate([jnp.zeros((b.shape[0], a.shape[1]), b.dtype), b], axis=1)
    return jnp.concatenate([top, bot], axis=0)


def _fuse_params(params, out_w):
    """Return (weights, biases): 6 fused [out, in] weights and 6 [out, 1] biases."""
    (gw1, gb1, gw2, gb2, gw3, gb3,
     fw1, fb1, fw2, fb2, fw3, fb3,
     hw1, hb1, hw2, hb2, hw3, hb3) = params
    # Fold the sigmoid-via-tanh 0.5 input pre-scale into the h rows of the last layer.
    hw3 = 0.5 * hw3
    hb3 = 0.5 * hb3
    cw1 = jnp.concatenate([fw1, hw1], axis=0)          # [2*latent, e_dim]
    cb1 = jnp.concatenate([fb1, hb1], axis=0)
    cw2 = _block_diag(fw2, hw2)                        # [2*latent, 2*latent]
    cb2 = jnp.concatenate([fb2, hb2], axis=0)
    cw3 = _block_diag(fw3, hw3)                        # [action_dim+1, 2*latent]
    cb3 = jnp.concatenate([fb3, hb3], axis=0)
    pad = out_w - cw3.shape[0]
    cw3 = jnp.pad(cw3, ((0, pad), (0, 0)))
    cb3 = jnp.pad(cb3, ((0, pad), (0, 0)))
    weights = (gw1, gw2, gw3, cw1, cw2, cw3)
    biases = (gb1, gb2, gb3, cb1, cb2, cb3)
    return weights, biases


def _choose_tiling(batch, tile_b_max):
    """Lane axis carries the batch, so tiles must be multiples of 128.

    Keeps >= 2 grid steps (targeting an even count) whenever batch > 128 so
    dimension_semantics=("parallel",) splits the work evenly across v7x's two
    TensorCores; v5e/v6e (1 TC) simply see fewer, larger steps.
    """
    tile_b_max = max(128, (tile_b_max // 128) * 128)
    if batch <= 128:
        return 128, 128
    n_steps = max(2, pl.cdiv(batch, tile_b_max))
    if n_steps % 2:
        n_steps += 1
    tile_b = _round_up(pl.cdiv(batch, n_steps), 128)
    return tile_b, _round_up(batch, tile_b)


def aacn_forward(x, params, *, tile_b_max=512, matmul_dtype=None):
    """AACN forward.

    x: [batch, state_dim*2] f32.
    params: flat 18-tuple (W [out, in], b [out, 1]) for the 9 linears in g/f/h order
      (native torch layout).
    tile_b_max: upper bound on the per-step batch tile (rounded to a multiple of 128);
      sweep 256-1024 (larger is fine with matmul_dtype=bf16).
    matmul_dtype: jnp.bfloat16 enables native-rate MXU on v5e/v6e/v7x (weights and the
      streamed x in bf16; accumulation, bias add and tanh stay f32 - relax comparison
      tolerances accordingly).  Default None keeps everything f32.
    """
    batch, in_dim = x.shape
    action_dim = params[11].shape[0]          # f_layer last bias: [action_dim, 1]
    latent = params[2].shape[0]               # g_layer W2: [latent, latent]
    e_dim = params[4].shape[0]                # g_layer W3: [e_dim, latent]
    out_w = _round_up(action_dim + 1, 8)      # packed (f, h) rows, sublane-aligned

    weights, biases = _fuse_params(params, out_w)
    if matmul_dtype is not None:
        # Weights and biases are kept separate, so only weights are cast; biases stay
        # f32 for the f32 accumulate/add.
        weights = tuple(w.astype(matmul_dtype) for w in weights)
        x = x.astype(matmul_dtype)

    tile_b, b_pad = _choose_tiling(batch, tile_b_max)
    grid = (b_pad // tile_b,)

    # Feature-major boundary: pad batch, transpose once so the lane axis is batch.
    x_t = jnp.pad(x, ((0, b_pad - batch), (0, 0))).T            # [in_dim, b_pad]

    fused = []
    for w, b in zip(weights, biases):
        fused.extend([w, b])
    # Constant index_map -> params are DMA'd once and stay VMEM-resident across steps.
    # TODO(synk): mark these invariant inputs pipeline_mode=pl.Buffered(1) (or pack them
    # into one VMEM slab) if latent/e_dim ever grow enough for VMEM residency to matter.
    weight_specs = [pl.BlockSpec(p.shape, lambda i: (0, 0)) for p in fused]

    itemsize = jnp.dtype(matmul_dtype or jnp.float32).itemsize
    weight_bytes = sum(int(math.prod(w.shape)) * itemsize for w in weights)
    bias_bytes = sum(int(math.prod(b.shape)) * 4 for b in biases)

    # Cost hint for XLA scheduling around the custom call.
    mm_cols = (in_dim * latent + latent * latent + latent * e_dim
               + e_dim * 2 * latent + (2 * latent) ** 2 + 2 * latent * out_w)
    tanh_rows = 2 * latent + e_dim + 2 * latent + 2 * latent + out_w
    cost = pl.CostEstimate(
        flops=2 * b_pad * mm_cols,
        transcendentals=b_pad * tanh_rows,
        bytes_accessed=(itemsize * b_pad * in_dim + weight_bytes + bias_bytes
                        + 4 * b_pad * out_w),
    )

    # VMEM budget: double-buffered resident params + double-buffered x/out tiles +
    # headroom proportional to tile_b for activation spills / Mosaic internals (plus a
    # small fixed floor).  Comfortably under v5e's 16 MiB scoped default and v7x's 64 MiB.
    act_rows = in_dim + latent + latent + e_dim + 2 * latent + 2 * latent + out_w
    vmem_bytes = int(2 * (weight_bytes + bias_bytes)
                     + 2 * (itemsize * in_dim + 4 * out_w) * tile_b
                     + 2 * 4 * act_rows * tile_b)
    vmem_bytes = max(vmem_bytes, 4 << 20)

    packed = pl.pallas_call(
        functools.partial(aacn_kernel, action_dim=action_dim),
        out_shape=jax.ShapeDtypeStruct((out_w, b_pad), jnp.float32),
        grid=grid,
        in_specs=[pl.BlockSpec((in_dim, tile_b), lambda i: (0, i))] + weight_specs,
        out_specs=pl.BlockSpec((out_w, tile_b), lambda i: (0, i)),
        compiler_params=pltpu.CompilerParams(
            dimension_semantics=("parallel",),
            vmem_limit_bytes=vmem_bytes,
        ),
        cost_estimate=cost,
    )(x_t, *fused)

    f_out = packed[:action_dim, :batch].T
    h_out = packed[action_dim:action_dim + 1, :batch].T
    return f_out, h_out


# ----------------------------------------------------------------------------- init / reference


def init_linear(key, in_dim, out_dim):
    """PyTorch-style uniform(-1/sqrt(in), 1/sqrt(in)); W as [out, in], b as [out, 1]."""
    kw, kb = jax.random.split(key)
    bound = 1.0 / jnp.sqrt(jnp.float32(in_dim))
    w = jax.random.uniform(kw, (out_dim, in_dim), jnp.float32, -bound, bound)
    b = jax.random.uniform(kb, (out_dim, 1), jnp.float32, -bound, bound)
    return w, b


def init_aacn_params(key, state_dim, e_dim, action_dim, latent_dim):
    dims = [
        (state_dim * 2, latent_dim), (latent_dim, latent_dim), (latent_dim, e_dim),   # g
        (e_dim, latent_dim), (latent_dim, latent_dim), (latent_dim, action_dim),      # f
        (e_dim, latent_dim), (latent_dim, latent_dim), (latent_dim, 1),               # h
    ]
    keys = jax.random.split(key, len(dims))
    params = []
    for k, (din, dout) in zip(keys, dims):
        w, b = init_linear(k, din, dout)
        params.extend([w, b])
    return tuple(params)


def aacn_reference(x, params):
    (gw1, gb1, gw2, gb2, gw3, gb3,
     fw1, fb1, fw2, fb2, fw3, fb3,
     hw1, hb1, hw2, hb2, hw3, hb3) = params

    def lin(a, w, b):            # torch layout: y = a @ W.T + b
        return jnp.dot(a, w.T, precision=lax.Precision.HIGHEST) + b.T

    t = jnp.tanh(lin(x, gw1, gb1))
    t = jnp.tanh(lin(t, gw2, gb2))
    e = jnp.tanh(lin(t, gw3, gb3))
    t = jnp.tanh(lin(e, fw1, fb1))
    t = jnp.tanh(lin(t, fw2, fb2))
    f_out = jnp.tanh(lin(t, fw3, fb3))
    t = jnp.tanh(lin(e, hw1, hb1))
    t = jnp.tanh(lin(t, hw2, hb2))
    h_out = jax.nn.sigmoid(lin(t, hw3, hb3))
    return f_out, h_out


if __name__ == "__main__":
    state_dim, e_dim, action_dim, latent_dim = 8, 16, 4, 32
    batch = 200   # not a tile multiple -> exercises padding and an even 2-step grid

    key = jax.random.PRNGKey(0)
    k_params, k_x = jax.random.split(key)

    params = init_aacn_params(k_params, state_dim, e_dim, action_dim, latent_dim)
    x = jax.random.normal(k_x, (batch, state_dim * 2), jnp.float32)

    f_ref, h_ref = aacn_reference(x, params)

    # f32 path: tight parity with the precision-pinned plain-JAX reference.
    fwd = jax.jit(aacn_forward)
    f_out, h_out = fwd(x, params)
    jax.block_until_ready((f_out, h_out))
    assert f_out.shape == (batch, action_dim)
    assert h_out.shape == (batch, 1)
    assert jnp.allclose(f_out, f_ref, atol=1e-4, rtol=1e-4)
    assert jnp.allclose(h_out, h_ref, atol=1e-4, rtol=1e-4)

    # bf16 matmul path (native MXU rate on v5e/v6e/v7x); accumulate/bias/tanh stay f32,
    # so outputs stay within bf16-rounding distance of the f32 reference.
    fwd_bf16 = jax.jit(functools.partial(aacn_forward, matmul_dtype=jnp.bfloat16))
    f_bf, h_bf = fwd_bf16(x, params)
    jax.block_until_ready((f_bf, h_bf))
    assert jnp.allclose(f_bf, f_ref, atol=1e-1)
    assert jnp.allclose(h_bf, h_ref, atol=1e-1)

    print("KERNEL_OK")
</pallas_src>

<mosaic_0001>
module attributes {stable_mosaic.version = 11 : i64} {
  func.func @aacn_kernel(%arg0: i32, %arg1: memref<16x128xf32, #tpu.memory_space<vmem>>, %arg2: memref<32x16xf32, #tpu.memory_space<vmem>>, %arg3: memref<32x1xf32, #tpu.memory_space<vmem>>, %arg4: memref<32x32xf32, #tpu.memory_space<vmem>>, %arg5: memref<32x1xf32, #tpu.memory_space<vmem>>, %arg6: memref<16x32xf32, #tpu.memory_space<vmem>>, %arg7: memref<16x1xf32, #tpu.memory_space<vmem>>, %arg8: memref<64x16xf32, #tpu.memory_space<vmem>>, %arg9: memref<64x1xf32, #tpu.memory_space<vmem>>, %arg10: memref<64x64xf32, #tpu.memory_space<vmem>>, %arg11: memref<64x1xf32, #tpu.memory_space<vmem>>, %arg12: memref<8x64xf32, #tpu.memory_space<vmem>>, %arg13: memref<8x1xf32, #tpu.memory_space<vmem>>, %arg14: memref<8x128xf32, #tpu.memory_space<vmem>>) attributes {dimension_semantics = [#tpu.dimension_semantics<parallel>], iteration_bounds = array<i64: 2>, scalar_prefetch = 0 : i64, scratch_operands = 0 : i64, tpu.core_type = #tpu.core_type<tc>, window_params = [{transform_indices = @transform_0, window_bounds = array<i64: 16, 128>}, {pipeline_mode = #tpu.pipeline_mode<synchronous>, transform_indices = @transform_1, window_bounds = array<i64: 32, 16>}, {pipeline_mode = #tpu.pipeline_mode<synchronous>, transform_indices = @transform_2, window_bounds = array<i64: 32, 1>}, {pipeline_mode = #tpu.pipeline_mode<synchronous>, transform_indices = @transform_3, window_bounds = array<i64: 32, 32>}, {pipeline_mode = #tpu.pipeline_mode<synchronous>, transform_indices = @transform_4, window_bounds = array<i64: 32, 1>}, {pipeline_mode = #tpu.pipeline_mode<synchronous>, transform_indices = @transform_5, window_bounds = array<i64: 16, 32>}, {pipeline_mode = #tpu.pipeline_mode<synchronous>, transform_indices = @transform_6, window_bounds = array<i64: 16, 1>}, {pipeline_mode = #tpu.pipeline_mode<synchronous>, transform_indices = @transform_7, window_bounds = array<i64: 64, 16>}, {pipeline_mode = #tpu.pipeline_mode<synchronous>, transform_indices = @transform_8, window_bounds = array<i64: 64, 1>}, {pipeline_mode = #tpu.pipeline_mode<synchronous>, transform_indices = @transform_9, window_bounds = array<i64: 64, 64>}, {pipeline_mode = #tpu.pipeline_mode<synchronous>, transform_indices = @transform_10, window_bounds = array<i64: 64, 1>}, {pipeline_mode = #tpu.pipeline_mode<synchronous>, transform_indices = @transform_11, window_bounds = array<i64: 8, 64>}, {pipeline_mode = #tpu.pipeline_mode<synchronous>, transform_indices = @transform_12, window_bounds = array<i64: 8, 1>}, {transform_indices = @transform_13, window_bounds = array<i64: 8, 128>}]} {
    %c0 = arith.constant 0 : index
    %c0_0 = arith.constant 0 : index
    %0 = vector.load %arg1[%c0, %c0_0] : memref<16x128xf32, #tpu.memory_space<vmem>>, vector<16x128xf32>
    %c0_1 = arith.constant 0 : index
    %c0_2 = arith.constant 0 : index
    %1 = vector.load %arg2[%c0_1, %c0_2] : memref<32x16xf32, #tpu.memory_space<vmem>>, vector<32x16xf32>
    %cst = arith.constant dense<0.000000e+00> : vector<32x128xf32>
    %2 = tpu.matmul %1, %0, %cst {dimension_numbers = #tpu.dot_dimension_numbers<[1], [0], [0], [1], [0, 0, 1, 1], [], []>} : vector<32x16xf32>, vector<16x128xf32>, vector<32x128xf32> -> vector<32x128xf32>
    %c0_3 = arith.constant 0 : index
    %c0_4 = arith.constant 0 : index
    %3 = vector.load %arg3[%c0_3, %c0_4] : memref<32x1xf32, #tpu.memory_space<vmem>>, vector<32x1xf32>
    %4 = vector.broadcast %3 : vector<32x1xf32> to vector<32x128xf32>
    %5 = arith.addf %2, %4 : vector<32x128xf32>
    %6 = math.tanh %5 : vector<32x128xf32>
    %c0_5 = arith.constant 0 : index
    %c0_6 = arith.constant 0 : index
    %7 = vector.load %arg4[%c0_5, %c0_6] : memref<32x32xf32, #tpu.memory_space<vmem>>, vector<32x32xf32>
    %cst_7 = arith.constant dense<0.000000e+00> : vector<32x128xf32>
    %8 = tpu.matmul %7, %6, %cst_7 {dimension_numbers = #tpu.dot_dimension_numbers<[1], [0], [0], [1], [0, 0, 1, 1], [], []>} : vector<32x32xf32>, vector<32x128xf32>, vector<32x128xf32> -> vector<32x128xf32>
    %c0_8 = arith.constant 0 : index
    %c0_9 = arith.constant 0 : index
    %9 = vector.load %arg5[%c0_8, %c0_9] : memref<32x1xf32, #tpu.memory_space<vmem>>, vector<32x1xf32>
    %10 = vector.broadcast %9 : vector<32x1xf32> to vector<32x128xf32>
    %11 = arith.addf %8, %10 : vector<32x128xf32>
    %12 = math.tanh %11 : vector<32x128xf32>
    %c0_10 = arith.constant 0 : index
    %c0_11 = arith.constant 0 : index
    %13 = vector.load %arg6[%c0_10, %c0_11] : memref<16x32xf32, #tpu.memory_space<vmem>>, vector<16x32xf32>
    %cst_12 = arith.constant dense<0.000000e+00> : vector<16x128xf32>
    %14 = tpu.matmul %13, %12, %cst_12 {dimension_numbers = #tpu.dot_dimension_numbers<[1], [0], [0], [1], [0, 0, 1, 1], [], []>} : vector<16x32xf32>, vector<32x128xf32>, vector<16x128xf32> -> vector<16x128xf32>
    %c0_13 = arith.constant 0 : index
    %c0_14 = arith.constant 0 : index
    %15 = vector.load %arg7[%c0_13, %c0_14] : memref<16x1xf32, #tpu.memory_space<vmem>>, vector<16x1xf32>
    %16 = vector.broadcast %15 : vector<16x1xf32> to vector<16x128xf32>
    %17 = arith.addf %14, %16 : vector<16x128xf32>
    %18 = math.tanh %17 : vector<16x128xf32>
    %c0_15 = arith.constant 0 : index
    %c0_16 = arith.constant 0 : index
    %19 = vector.load %arg8[%c0_15, %c0_16] : memref<64x16xf32, #tpu.memory_space<vmem>>, vector<64x16xf32>
    %cst_17 = arith.constant dense<0.000000e+00> : vector<64x128xf32>
    %20 = tpu.matmul %19, %18, %cst_17 {dimension_numbers = #tpu.dot_dimension_numbers<[1], [0], [0], [1], [0, 0, 1, 1], [], []>} : vector<64x16xf32>, vector<16x128xf32>, vector<64x128xf32> -> vector<64x128xf32>
    %c0_18 = arith.constant 0 : index
    %c0_19 = arith.constant 0 : index
    %21 = vector.load %arg9[%c0_18, %c0_19] : memref<64x1xf32, #tpu.memory_space<vmem>>, vector<64x1xf32>
    %22 = vector.broadcast %21 : vector<64x1xf32> to vector<64x128xf32>
    %23 = arith.addf %20, %22 : vector<64x128xf32>
    %24 = math.tanh %23 : vector<64x128xf32>
    %c0_20 = arith.constant 0 : index
    %c0_21 = arith.constant 0 : index
    %25 = vector.load %arg10[%c0_20, %c0_21] : memref<64x64xf32, #tpu.memory_space<vmem>>, vector<64x64xf32>
    %cst_22 = arith.constant dense<0.000000e+00> : vector<64x128xf32>
    %26 = tpu.matmul %25, %24, %cst_22 {dimension_numbers = #tpu.dot_dimension_numbers<[1], [0], [0], [1], [0, 0, 1, 1], [], []>} : vector<64x64xf32>, vector<64x128xf32>, vector<64x128xf32> -> vector<64x128xf32>
    %c0_23 = arith.constant 0 : index
    %c0_24 = arith.constant 0 : index
    %27 = vector.load %arg11[%c0_23, %c0_24] : memref<64x1xf32, #tpu.memory_space<vmem>>, vector<64x1xf32>
    %28 = vector.broadcast %27 : vector<64x1xf32> to vector<64x128xf32>
    %29 = arith.addf %26, %28 : vector<64x128xf32>
    %30 = math.tanh %29 : vector<64x128xf32>
    %c0_25 = arith.constant 0 : index
    %c0_26 = arith.constant 0 : index
    %31 = vector.load %arg12[%c0_25, %c0_26] : memref<8x64xf32, #tpu.memory_space<vmem>>, vector<8x64xf32>
    %cst_27 = arith.constant dense<0.000000e+00> : vector<8x128xf32>
    %32 = tpu.matmul %31, %30, %cst_27 {dimension_numbers = #tpu.dot_dimension_numbers<[1], [0], [0], [1], [0, 0, 1, 1], [], []>} : vector<8x64xf32>, vector<64x128xf32>, vector<8x128xf32> -> vector<8x128xf32>
    %c0_28 = arith.constant 0 : index
    %c0_29 = arith.constant 0 : index
    %33 = vector.load %arg13[%c0_28, %c0_29] : memref<8x1xf32, #tpu.memory_space<vmem>>, vector<8x1xf32>
    %34 = vector.broadcast %33 : vector<8x1xf32> to vector<8x128xf32>
    %35 = arith.addf %32, %34 : vector<8x128xf32>
    %36 = math.tanh %35 : vector<8x128xf32>
    %37 = tpu.iota {dimensions = array<i32: 0>} : vector<8x1xi32>
    %c4_i32 = arith.constant 4 : i32
    %38 = vector.broadcast %c4_i32 : i32 to vector<8x1xi32>
    %39 = arith.cmpi eq, %37, %38 : vector<8x1xi32>
    %cst_30 = arith.constant 5.000000e-01 : f32
    %40 = vector.broadcast %cst_30 : f32 to vector<8x128xf32>
    %41 = arith.mulf %40, %36 : vector<8x128xf32>
    %cst_31 = arith.constant 5.000000e-01 : f32
    %42 = vector.broadcast %cst_31 : f32 to vector<8x128xf32>
    %43 = arith.addf %41, %42 : vector<8x128xf32>
    %44 = vector.shape_cast %39 : vector<8x1xi1> to vector<8x1xi1>
    %45 = vector.broadcast %44 : vector<8x1xi1> to vector<8x128xi1>
    %46 = arith.select %45, %43, %36 : vector<8x128xi1>, vector<8x128xf32>
    %c0_32 = arith.constant 0 : index
    %c0_33 = arith.constant 0 : index
    %47 = vector.load %arg14[%c0_32, %c0_33] : memref<8x128xf32, #tpu.memory_space<vmem>>, vector<8x128xf32>
    tpu.vector_store %arg14[%c0_32, %c0_33], %46 {strides = array<i32>} : memref<8x128xf32, #tpu.memory_space<vmem>>, vector<8x128xf32>,
    return
  }
  func.func @transform_0(%arg0: i32) -> (i32, i32) {
    %c0_i32 = arith.constant 0 : i32
    %c0_i32_0 = arith.constant 0 : i32
    return %c0_i32, %arg0 : i32, i32
  }
  func.func @transform_1(%arg0: i32) -> (i32, i32) {
    %c0_i32 = arith.constant 0 : i32
    %c0_i32_0 = arith.constant 0 : i32
    %c0_i32_1 = arith.constant 0 : i32
    return %c0_i32, %c0_i32_0 : i32, i32
  }
  func.func @transform_2(%arg0: i32) -> (i32, i32) {
    %c0_i32 = arith.constant 0 : i32
    %c0_i32_0 = arith.constant 0 : i32
    %c0_i32_1 = arith.constant 0 : i32
    return %c0_i32, %c0_i32_0 : i32, i32
  }
  func.func @transform_3(%arg0: i32) -> (i32, i32) {
    %c0_i32 = arith.constant 0 : i32
    %c0_i32_0 = arith.constant 0 : i32
    %c0_i32_1 = arith.constant 0 : i32
    return %c0_i32, %c0_i32_0 : i32, i32
  }
  func.func @transform_4(%arg0: i32) -> (i32, i32) {
    %c0_i32 = arith.constant 0 : i32
    %c0_i32_0 = arith.constant 0 : i32
    %c0_i32_1 = arith.constant 0 : i32
    return %c0_i32, %c0_i32_0 : i32, i32
  }
  func.func @transform_5(%arg0: i32) -> (i32, i32) {
    %c0_i32 = arith.constant 0 : i32
    %c0_i32_0 = arith.constant 0 : i32
    %c0_i32_1 = arith.constant 0 : i32
    return %c0_i32, %c0_i32_0 : i32, i32
  }
  func.func @transform_6(%arg0: i32) -> (i32, i32) {
    %c0_i32 = arith.constant 0 : i32
    %c0_i32_0 = arith.constant 0 : i32
    %c0_i32_1 = arith.constant 0 : i32
    return %c0_i32, %c0_i32_0 : i32, i32
  }
  func.func @transform_7(%arg0: i32) -> (i32, i32) {
    %c0_i32 = arith.constant 0 : i32
    %c0_i32_0 = arith.constant 0 : i32
    %c0_i32_1 = arith.constant 0 : i32
    return %c0_i32, %c0_i32_0 : i32, i32
  }
  func.func @transform_8(%arg0: i32) -> (i32, i32) {
    %c0_i32 = arith.constant 0 : i32
    %c0_i32_0 = arith.constant 0 : i32
    %c0_i32_1 = arith.constant 0 : i32
    return %c0_i32, %c0_i32_0 : i32, i32
  }
  func.func @transform_9(%arg0: i32) -> (i32, i32) {
    %c0_i32 = arith.constant 0 : i32
    %c0_i32_0 = arith.constant 0 : i32
    %c0_i32_1 = arith.constant 0 : i32
    return %c0_i32, %c0_i32_0 : i32, i32
  }
  func.func @transform_10(%arg0: i32) -> (i32, i32) {
    %c0_i32 = arith.constant 0 : i32
    %c0_i32_0 = arith.constant 0 : i32
    %c0_i32_1 = arith.constant 0 : i32
    return %c0_i32, %c0_i32_0 : i32, i32
  }
  func.func @transform_11(%arg0: i32) -> (i32, i32) {
    %c0_i32 = arith.constant 0 : i32
    %c0_i32_0 = arith.constant 0 : i32
    %c0_i32_1 = arith.constant 0 : i32
    return %c0_i32, %c0_i32_0 : i32, i32
  }
  func.func @transform_12(%arg0: i32) -> (i32, i32) {
    %c0_i32 = arith.constant 0 : i32
    %c0_i32_0 = arith.constant 0 : i32
    %c0_i32_1 = arith.constant 0 : i32
    return %c0_i32, %c0_i32_0 : i32, i32
  }
  func.func @transform_13(%arg0: i32) -> (i32, i32) {
    %c0_i32 = arith.constant 0 : i32
    %c0_i32_0 = arith.constant 0 : i32
    return %c0_i32, %arg0 : i32, i32
  }
}

</mosaic_0001>

<bundles_post_ra>
// kernel: aacn_forward.1
= control target key start
LH: loop header
LB: loop body
LE: loop exit
PB: predicated region body
PF: predicated region fallthrough
CT: control target
= control target key end

     0   :  { %s1797_s25 = smov 0   ;;  %s1799_s26 = smov 0   ;;  %s2040_s0 = inlined_call_operand.vmem [shape: f32[16,256], index: 0, kind: input, shape index: {}]   ;;  %s2041_s1 = inlined_call_operand.vmem [shape: f32[32,16], index: 1, kind: input, shape index: {}]   ;;  %s2042_s2 = inlined_call_operand.vmem [shape: f32[32,1], index: 2, kind: input, shape index: {}]   ;;  %s2043_s3 = inlined_call_operand.vmem [shape: f32[32,32], index: 3, kind: input, shape index: {}]   ;;  %s2044_s4 = inlined_call_operand.vmem [shape: f32[32,1], index: 4, kind: input, shape index: {}]   ;;  %s2045_s5 = inlined_call_operand.vmem [shape: f32[16,32], index: 5, kind: input, shape index: {}]   ;;  %s2046_s6 = inlined_call_operand.vmem [shape: f32[16,1], index: 6, kind: input, shape index: {}]   ;;  %s2047_s7 = inlined_call_operand.vmem [shape: f32[64,16], index: 7, kind: input, shape index: {}]   ;;  %s2048_s8 = inlined_call_operand.vmem [shape: f32[64,1], index: 8, kind: input, shape index: {}]   ;;  %s2049_s9 = inlined_call_operand.vmem [shape: f32[64,64], index: 9, kind: input, shape index: {}]   ;;  %s2050_s10 = inlined_call_operand.vmem [shape: f32[64,1], index: 10, kind: input, shape index: {}]   ;;  %s2051_s11 = inlined_call_operand.vmem [shape: f32[8,64], index: 11, kind: input, shape index: {}]   ;;  %s2052_s12 = inlined_call_operand.vmem [shape: f32[8,1], index: 12, kind: input, shape index: {}]   ;;  %s2053_s13 = inlined_call_operand.vmem [shape: f32[8,256], index: 13, kind: output, shape index: {}]  }
   0x1   :  { %s1801_s27 = smov 0  }
   0x2 LB: > { %s1372_s28 = sadd.s32 4294967295, %s1721_s27   ;;  %s1814_s29 = sadd.s32 1, %s1721_s27   ;;  %s1721_s27 = sphi %s1801_s27, %s2056_s27   ;;  %s1717_s26 = sphi %s1799_s26, %s2055_s26   ;;  %s1713_s25 = sphi %s1797_s25, %s2054_s25  }
   0x3   : > { %s27_s30 = ssub.s32 %s1721_s27, %s1814_s29  ;;  %s30_s14 = sadd.s32 1, %s1717_s26 }
   0x4   : > { %p28_p0 = scmp.eq.s32.totalorder %s27_s30, 0  ;;  %p37_p1 = scmp.ne.s32.totalorder %s1717_s26, %s1713_s25 }
   0x5   : > { %p38_p2 = scmp.eq.s32.totalorder %s1721_s27, 0  ;;  %p1375_p4 = scmp.ge.s32.totalorder %s1721_s27, 2 }
   0x6   : > { %s1823_s15 = scalar_select %p28_p0, %s1717_s26, %s30_s14  }
   0x7   : > { %p39_p3 = por %p38_p2, %p37_p1  ;;  %377 = sbr.rel (%p1375_p4) target bundleno = 21 (0x15), region = 64 }
   0xe   : > { %380 = sbr.rel (!%p39_p3) target bundleno = 21 (0x15), region = 68  ;;  %s382_s16 = sand.u32 (%p39_p3), 1, %s1717_s26  }
   0xf   : > { %s1377_s17 = sshll.u32 (%p39_p3), %s1721_s27, 3  ;;  %s1376_s18 = sshll.u32 (%p39_p3), %s382_s16, 4 }
  0x10   : > { %s386_s21 = scalar_lea.vmem (%p39_p3), %s2040_s0, %s1377_s17  ;;  %s384_s22 = scalar_lea.vmem (%p39_p3), [#allocation2], %s1376_s18 }
  0x11   : > { %v416_v0 = vld [vmem:[%s386_s21] sm:$0xff] (%p39_p3)  ;;  %v418_v1 = vld [vmem:[%s386_s21 + $0x10] sm:$0xff] (%p39_p3) }
  0x12   : > { %417 = vst [vmem:[%s384_s22] sm:$0xff] (%p39_p3), %v416_v0  ;;  %419 = vst [vmem:[%s384_s22 + $0x8] sm:$0xff] (%p39_p3), %v418_v1 }
  0x15 PF: > { %p1378_p5 = scmp.ge.s32.totalorder %s1721_s27, 1  ;;  %p424_p6 = scmp.lt.s32.totalorder %s1721_s27, 3 }
  0x17   : > { %p425_p7 = pnand %p1378_p5, %p424_p6 }
  0x18   : > { %s431_s23 = sand.u32 (!%p425_p7), 1, %s1713_s25   ;;  %v479_v2 = vld [vmem:[%s2041_s1] sm:$0xff] (!%p425_p7)  ;;  %vm507_vm0 = vcmask (!%p425_p7), 130048   ;;  %v1723_v3 = vmov (!%p425_p7), 0   ;;  %v485_v5 = vld [vmem:[%s2042_s2 + $0x10] sm:$0xff] (!%p425_p7)  ;;  %v484_v8 = vld [vmem:[%s2042_s2 + $0x8] sm:$0xff] (!%p425_p7) }
  0x19   : > { %428 = sbr.rel (%p425_p7) target bundleno = 1456 (0x5b0), region = 106  ;;  %s1379_s14 = sshll.u32 (!%p425_p7), %s431_s23, 4  ;;  %1469 = vmatprep.mubr.msk.f32.mxu0 (!%p425_p7), %vm507_vm0, %v479_v2  ;;  %1643 = vset.pattern.permute.xlu0 (!%p425_p7), %v1723_v3  ;;  %v483_v4 = vld [vmem:[%s2042_s2] sm:$0xff] (!%p425_p7)  ;;  %v486_v10 = vld [vmem:[%s2042_s2 + $0x18] sm:$0xff] (!%p425_p7)  ;;  %v480_v11 = vld [vmem:[%s2041_s1 + $0x8] sm:$0xff] (!%p425_p7)  ;;  %vm637_vm1 = vcmask (!%p425_p7), 261120  }
  0x1a   : > { %489 = vperm.xlu0 (!%p425_p7), %1643, %v483_v4   ;;  %1644 = vset.pattern.permute.xlu1 (!%p425_p7), %v1723_v3  ;;  %s433_s25 = scalar_lea.vmem (!%p425_p7), [#allocation2], %s1379_s14  ;;  %v613_v12 = vld [vmem:[%s2044_s4] sm:$0xff] (!%p425_p7)  ;;  %v481_v13 = vld [vmem:[%s2041_s1 + $0x10] sm:$0xff] (!%p425_p7)  ;;  %v614_v14 = vld [vmem:[%s2044_s4 + $0x8] sm:$0xff] (!%p425_p7)  ;;  %vm1085_vm2 = vcmask (!%p425_p7), 523264   ;;  %vm1725_vm3 = vmmov (!%p425_p7), 0  }
  0x1b   : > { %v477_v6 = vld [vmem:[%s433_s25] sm:$0xff] (!%p425_p7)  ;;  %v478_v7 = vld [vmem:[%s433_s25 + $0x8] sm:$0xff] (!%p425_p7)  ;;  %499 = vperm.xlu1 (!%p425_p7), %1644, %v485_v5   ;;  %p473_p8 = scmp.lt.s32.totalorder (!%p425_p7), %s1372_s28, 1 }
  0x1c   : > { %v1563_v9 = vpack.c.bf16 (!%p425_p7), %v478_v7, %v477_v6  ;;  %v482_v15 = vld [vmem:[%s2041_s1 + $0x18] sm:$0xff] (!%p425_p7)  ;;  %v615_v16 = vld [vmem:[%s2044_s4 + $0x10] sm:$0xff] (!%p425_p7)  ;;  %v741_v18 = vld [vmem:[%s2046_s6] sm:$0xff] (!%p425_p7) }
  0x1d   : > { %v616_v17 = vld [vmem:[%s2044_s4 + $0x18] sm:$0xff] (!%p425_p7)  ;;  %v742_v19 = vld [vmem:[%s2046_s6 + $0x8] sm:$0xff] (!%p425_p7)  ;;  %v844_v20 = vld [vmem:[%s2048_s8] sm:$0xff] (!%p425_p7) }
  0x1e   : > { %1564 = vmatprep.subr.bf16.mxu0 (!%p425_p7), %v1563_v9  ;;  %494 = vperm.xlu0 (!%p425_p7), %1643, %v484_v8   ;;  %v845_v21 = vld [vmem:[%s2048_s8 + $0x8] sm:$0xff] (!%p425_p7)  ;;  %v846_v22 = vld [vmem:[%s2048_s8 + $0x10] sm:$0xff] (!%p425_p7)  ;;  %v847_v23 = vld [vmem:[%s2048_s8 + $0x18] sm:$0xff] (!%p425_p7) }
  0x1f   : > { %1566 = vmatpush3.bf16.msra.mxu0 (!%p425_p7), %v1563_v9  ;;  %504 = vperm.xlu1 (!%p425_p7), %1644, %v486_v10   ;;  %v848_v24 = vld [vmem:[%s2048_s8 + $0x20] sm:$0xff] (!%p425_p7)  ;;  %v849_v25 = vld [vmem:[%s2048_s8 + $0x28] sm:$0xff] (!%p425_p7)  ;;  %v850_v26 = vld [vmem:[%s2048_s8 + $0x30] sm:$0xff] (!%p425_p7) }
  0x20   : > { %v851_v27 = vld [vmem:[%s2048_s8 + $0x38] sm:$0xff]  ;;  %v1037_v28 = vld [vmem:[%s2050_s10] sm:$0xff]  ;;  %v1038_v29 = vld [vmem:[%s2050_s10 + $0x8] sm:$0xff]  ;;  %s2058_s28 = smov (!%p473_p8, %s1372_s28), 1 }
  0x21   : > { %v1039_v30 = vld [vmem:[%s2050_s10 + $0x10] sm:$0xff]  ;;  %v1040_v31 = vld [vmem:[%s2050_s10 + $0x18] sm:$0xff]  ;;  %v1041_v32 = vld [vmem:[%s2050_s10 + $0x20] sm:$0xff]  ;;  %s1380_s14 = sshll.u32 %s2058_s28, 3 }
  0x22   : > { %1470 = vmatmul.mubr.msk.f32.vlgmr.msra.gmra.mrb[0].mxu0 %vm507_vm0, %v480_v11  ;;  %619 = vperm.xlu0 %1643, %v613_v12   ;;  %v1042_v33 = vld [vmem:[%s2050_s10 + $0x28] sm:$0xff]  ;;  %v1043_v34 = vld [vmem:[%s2050_s10 + $0x30] sm:$0xff]  ;;  %v1044_v35 = vld [vmem:[%s2050_s10 + $0x38] sm:$0xff]  ;;  %s476_s18 = scalar_lea.vmem %s2053_s13, %s1380_s14 }
  0x23   : > { %1472 = vmatprep.mubr.msk.f32.mxu0 %vm507_vm0, %v481_v13  ;;  %624 = vperm.xlu1 %1644, %v614_v14   ;;  %v1224_v36 = vld [vmem:[%s2052_s12] sm:$0xff]  ;;  %v610_v56 = vld [vmem:[%s2043_s3 + $0x8] sm:$0xff]  ;;  %v611_v57 = vld [vmem:[%s2043_s3 + $0x10] sm:$0xff] }
  0x24   : > { %v609_v37 = vld [vmem:[%s2043_s3] sm:$0xff]  ;;  %v612_v58 = vld [vmem:[%s2043_s3 + $0x18] sm:$0xff]  ;;  %v740_v14 = vld [vmem:[%s2045_s5 + $0x8] sm:$0xff] }
  0x25   : > { %1483 = vmatprep.mubr.msk.f32.mxu1 %vm637_vm1, %v609_v37  ;;  %v739_v59 = vld [vmem:[%s2045_s5] sm:$0xff] }
  0x26   : > { %1473 = vmatmul.mubr.msk.f32.gmra.mrb[2].mxu0 %vm507_vm0, %v482_v15  ;;  %629 = vperm.xlu0 %1643, %v615_v16   ;;  %v836_v15 = vld [vmem:[%s2047_s7] sm:$0xff] }
  0x27   : > { %634 = vperm.xlu1 %1644, %v616_v17   ;;  %1497 = vmatprep.mubr.msk.f32.mxu0 %vm637_vm1, %v739_v59 }
  0x2a   : > { %745 = vperm.xlu0 %1643, %v741_v18  }
  0x2b   : > { %750 = vperm.xlu1 %1644, %v742_v19  }
  0x2e   : > { %854 = vperm.xlu0 %1643, %v844_v20  }
  0x2f   : > { %859 = vperm.xlu1 %1644, %v845_v21  }
  0x32   : > { %864 = vperm.xlu0 %1643, %v846_v22  }
  0x33   : > { %869 = vperm.xlu1 %1644, %v847_v23  }
  0x36   : > { %874 = vperm.xlu0 %1643, %v848_v24  }
  0x37   : > { %879 = vperm.xlu1 %1644, %v849_v25   ;;  %v837_v25 = vld [vmem:[%s2047_s7 + $0x8] sm:$0xff] }
  0x3a   : > { %884 = vperm.xlu0 %1643, %v850_v26   ;;  %v838_v26 = vld [vmem:[%s2047_s7 + $0x10] sm:$0xff] }
  0x3b   : > { %889 = vperm.xlu1 %1644, %v851_v27   ;;  %v839_v27 = vld [vmem:[%s2047_s7 + $0x18] sm:$0xff] }
  0x3e   : > { %1047 = vperm.xlu0 %1643, %v1037_v28   ;;  %v840_v28 = vld [vmem:[%s2047_s7 + $0x20] sm:$0xff] }
  0x3f   : > { %1052 = vperm.xlu1 %1644, %v1038_v29   ;;  %v841_v29 = vld [vmem:[%s2047_s7 + $0x28] sm:$0xff] }
  0x42   : > { %1057 = vperm.xlu0 %1643, %v1039_v30   ;;  %v842_v30 = vld [vmem:[%s2047_s7 + $0x30] sm:$0xff] }
  0x43   : > { %1062 = vperm.xlu1 %1644, %v1040_v31   ;;  %v843_v31 = vld [vmem:[%s2047_s7 + $0x38] sm:$0xff] }
  0x46   : > { %1067 = vperm.xlu0 %1643, %v1041_v32   ;;  %v1029_v32 = vld [vmem:[%s2049_s9] sm:$0xff] }
  0x47   : > { %1072 = vperm.xlu1 %1644, %v1042_v33  }
  0x4a   : > { %1077 = vperm.xlu0 %1643, %v1043_v34  }
  0x4b   : > { %1082 = vperm.xlu1 %1644, %v1044_v35  }
  0x4e   : > { %1227 = vperm.xlu0 %1643, %v1224_v36  }
  0x99   : > { %v490_v38 = vpop.permute.xlu0 %489 }
  0x9a   : > { %v500_v39 = vpop.permute.xlu1 %499 }
  0x9d   : > { %v495_v40 = vpop.permute.xlu0 %494 }
  0x9e   : > { %v505_v45 = vpop.permute.xlu1 %504 }
  0xa1   : > { %v620_v61 = vpop.permute.xlu0 %619 }
  0xa2   : > { %v625_v60 = vpop.permute.xlu1 %624 }
  0xa5   : > { %v630_v4 = vpop.permute.xlu0 %629 }
  0xa6   : > { %v635_v2 = vpop.permute.xlu1 %634 }
  0xa9   : > { %v746_v18 = vpop.permute.xlu0 %745 }
  0xaa   : > { %v751_v16 = vpop.permute.xlu1 %750 }
  0xad   : > { %v855_v34 = vpop.permute.xlu0 %854 }
  0xae   : > { %v860_v33 = vpop.permute.xlu1 %859 }
  0xb1   : > { %v865_v37 = vpop.permute.xlu0 %864 }
  0xb2   : > { %v870_v35 = vpop.permute.xlu1 %869 }
  0xf5   : > { %v1471_v41 = vpop.f32.mrb[0].mxu0 }
  0xf6   : > { %v592_v42 = vadd.f32 %v1471_v41, %v495_v40  ;;  %v586_v43 = vpop.f32.mrb[1].mxu0 }
  0xf7   : > { %v587_v44 = vadd.f32 %v586_v43, %v490_v38 }
  0xf8   : > { %1645 = vtanh.f32 %v592_v42 }
  0xf9   : > { %1647 = vtanh.f32 %v587_v44  ;;  %v1474_v46 = vpop.f32.mrb[2].mxu0  ;;  %v880_v44 = vpop.permute.xlu1 %879 }
  0xfa   : > { %v602_v47 = vadd.f32 %v1474_v46, %v505_v45  ;;  %v596_v48 = vpop.f32.mrb[3].mxu0  ;;  %v875_v46 = vpop.permute.xlu0 %874 }
  0xfb   : > { %v597_v49 = vadd.f32 %v596_v48, %v500_v39 }
  0xfc   : > { %1649 = vtanh.f32 %v602_v47 }
  0xfd   : > { %1651 = vtanh.f32 %v597_v49 }
 0x102   : > { %v1646_v50 = vpop.eup %1645 }
 0x103   : > { %v1648_v51 = vpop.eup %1647 }
 0x104   : > { %v1567_v52 = vpack.c.bf16 %v1646_v50, %v1648_v51  ;;  %v890_v51 = vpop.permute.xlu1 %889 }
 0x106   : > { %v1650_v53 = vpop.eup %1649  ;;  %1568 = vmatprep.subr.bf16.mxu1 %v1567_v52 }
 0x107   : > { %v1652_v54 = vpop.eup %1651  ;;  %1570 = vmatpush3.bf16.msra.mxu1 %v1567_v52 }
 0x108   : > { %v1571_v55 = vpack.c.bf16 %v1650_v53, %v1652_v54  ;;  %v885_v54 = vpop.permute.xlu0 %884 }
 0x10a   : > { %1572 = vmatprep.subr.bf16.mxu1 %v1571_v55 }
 0x10b   : > { %1574 = vmatpush3.bf16.msra.mxu1 %v1571_v55 }
 0x10e   : > { %1484 = vmatmul.mubr.msk.f32.vlgmr.msra.gmra.mrb[0].mxu1 %vm637_vm1, %v610_v56 }
 0x10f   : > { %1486 = vmatprep.mubr.msk.f32.mxu1 %vm637_vm1, %v611_v57 }
 0x112   : > { %1487 = vmatmul.mubr.msk.f32.gmra.mrb[2].mxu1 %vm637_vm1, %v612_v58 }
 0x113   : > { %1532 = vmatprep.mubr.msk.f32.mxu1 %vm1085_vm2, %v1029_v32 }
 0x1e1   : > { %v1485_v62 = vpop.f32.mrb[0].mxu1 }
 0x1e2   : > { %v722_v63 = vadd.f32 %v1485_v62, %v625_v60  ;;  %v716_v0 = vpop.f32.mrb[1].mxu1 }
 0x1e3   : > { %v717_v1 = vadd.f32 %v716_v0, %v620_v61 }
 0x1e4   : > { %1653 = vtanh.f32 %v722_v63 }
 0x1e5   : > { %1655 = vtanh.f32 %v717_v1  ;;  %v1488_v3 = vpop.f32.mrb[2].mxu1 }
 0x1e6   : > { %v732_v5 = vadd.f32 %v1488_v3, %v635_v2  ;;  %v726_v6 = vpop.f32.mrb[3].mxu1 }
 0x1e7   : > { %v727_v7 = vadd.f32 %v726_v6, %v630_v4  ;;  %v1031_v6 = vld [vmem:[%s2049_s9 + $0x10] sm:$0xff] }
 0x1e8   : > { %1657 = vtanh.f32 %v732_v5  ;;  %v1030_v5 = vld [vmem:[%s2049_s9 + $0x8] sm:$0xff] }
 0x1e9   : > { %1659 = vtanh.f32 %v727_v7  ;;  %v1032_v7 = vld [vmem:[%s2049_s9 + $0x18] sm:$0xff] }
 0x1ee   : > { %v1654_v8 = vpop.eup %1653 }
 0x1ef   : > { %v1656_v9 = vpop.eup %1655 }
 0x1f0   : > { %v1575_v10 = vpack.c.bf16 %v1654_v8, %v1656_v9  ;;  %v1033_v8 = vld [vmem:[%s2049_s9 + $0x20] sm:$0xff]  ;;  %v1034_v9 = vld [vmem:[%s2049_s9 + $0x28] sm:$0xff] }
 0x1f2   : > { %v1658_v11 = vpop.eup %1657  ;;  %1576 = vmatprep.subr.bf16.mxu0 %v1575_v10 }
 0x1f3   : > { %v1660_v12 = vpop.eup %1659  ;;  %1578 = vmatpush3.bf16.msra.mxu0 %v1575_v10  ;;  %v1035_v10 = vld [vmem:[%s2049_s9 + $0x30] sm:$0xff] }
 0x1f4   : > { %v1579_v13 = vpack.c.bf16 %v1658_v11, %v1660_v12  ;;  %v1036_v11 = vld [vmem:[%s2049_s9 + $0x38] sm:$0xff]  ;;  %v1724_v12 = vmov 0.0|0.0  }
 0x1f6   : > { %1580 = vmatprep.subr.bf16.mxu0 %v1579_v13 }
 0x1f7   : > { %1582 = vmatpush3.bf16.msra.mxu0 %v1579_v13  ;;  %v1726_v13 = vmov 0.0  }
 0x1fa   : > { %1498 = vmatmul.mubr.msk.f32.vlgmr.msra.gmra.mrb[4].mxu0 %vm637_vm1, %v740_v14  ;;  %v1053_v14 = vpop.permute.xlu1 %1052 }
 0x1fb   : > { %1504 = vmatprep.mubr.msk.f32.mxu0 %vm507_vm0, %v836_v15  ;;  %v1048_v15 = vpop.permute.xlu0 %1047 }
 0x2cd   : > { %v1499_v17 = vpop.f32.mrb[4].mxu0 }
 0x2ce   : > { %v831_v19 = vadd.f32 %v1499_v17, %v751_v16  ;;  %v825_v20 = vpop.f32.mrb[5].mxu0  ;;  %v1063_v16 = vpop.permute.xlu1 %1062 }
 0x2cf   : > { %v826_v21 = vadd.f32 %v825_v20, %v746_v18  ;;  %v1058_v18 = vpop.permute.xlu0 %1057 }
 0x2d0   : > { %1661 = vtanh.f32 %v831_v19 }
 0x2d1   : > { %1663 = vtanh.f32 %v826_v21 }
 0x2da   : > { %v1662_v22 = vpop.eup %1661 }
 0x2db   : > { %v1664_v23 = vpop.eup %1663 }
 0x2dc   : > { %v1583_v24 = vpack.c.bf16 %v1662_v22, %v1664_v23 }
 0x2de   : > { %1584 = vmatprep.subr.bf16.mxu0 %v1583_v24 }
 0x2df   : > { %1586 = vmatpush3.bf16.msra.mxu0 %v1583_v24 }
 0x2e0   : > { %1603 = vmatprep.subr.bf16.mxu0 %v1724_v12 }
 0x2e2   : > { %1505 = vmatmul.mubr.msk.f32.vlgmr.msra.gmra.mrb[6].mxu0 %vm507_vm0, %v837_v25  ;;  %v1073_v25 = vpop.permute.xlu1 %1072 }
 0x2e3   : > { %1507 = vmatprep.mubr.msk.f32.mxu0 %vm507_vm0, %v838_v26 }
 0x2e6   : > { %1508 = vmatmul.mubr.msk.f32.gmra.mrb[8].mxu0 %vm507_vm0, %v839_v27  ;;  %v1068_v27 = vpop.permute.xlu0 %1067  ;;  %v1083_v32 = vpop.permute.xlu1 %1082 }
 0x2e7   : > { %1510 = vmatprep.mubr.msk.f32.mxu0 %vm507_vm0, %v840_v28 }
 0x2ea   : > { %1511 = vmatmul.mubr.msk.f32.gmra.mrb[10].mxu0 %vm507_vm0, %v841_v29 }
 0x2eb   : > { %1513 = vmatprep.mubr.msk.f32.mxu0 %vm507_vm0, %v842_v30 }
 0x2ee   : > { %1514 = vmatmul.mubr.msk.f32.gmra.mrb[12].mxu0 %vm507_vm0, %v843_v31 }
 0x2ef   : > { %1560 = vmatprep.mubr.msk.f32.mxu0 %vm1725_vm3, %v1726_v13 }
 0x3b5   : > { %v1506_v36 = vpop.f32.mrb[6].mxu0 }
 0x3b6   : > { %v988_v38 = vadd.f32 %v1506_v36, %v860_v33  ;;  %v982_v39 = vpop.f32.mrb[7].mxu0 }
 0x3b7   : > { %v983_v40 = vadd.f32 %v982_v39, %v855_v34 }
 0x3b8   : > { %1665 = vtanh.f32 %v988_v38 }
 0x3b9   : > { %1667 = vtanh.f32 %v983_v40  ;;  %v1509_v41 = vpop.f32.mrb[8].mxu0 }
 0x3ba   : > { %v998_v42 = vadd.f32 %v1509_v41, %v870_v35  ;;  %v992_v43 = vpop.f32.mrb[9].mxu0  ;;  %v1078_v35 = vpop.permute.xlu0 %1077 }
 0x3bb   : > { %v993_v45 = vadd.f32 %v992_v43, %v865_v37 }
 0x3bc   : > { %1669 = vtanh.f32 %v998_v42 }
 0x3bd   : > { %1671 = vtanh.f32 %v993_v45  ;;  %v1512_v47 = vpop.f32.mrb[10].mxu0 }
 0x3be   : > { %v1008_v48 = vadd.f32 %v1512_v47, %v880_v44  ;;  %v1002_v49 = vpop.f32.mrb[11].mxu0 }
 0x3bf   : > { %v1003_v50 = vadd.f32 %v1002_v49, %v875_v46 }
 0x3c0   : > { %1673 = vtanh.f32 %v1008_v48 }
 0x3c1   : > { %1675 = vtanh.f32 %v1003_v50  ;;  %v1515_v52 = vpop.f32.mrb[12].mxu0  ;;  %v1223_v50 = vld [vmem:[%s2051_s11] sm:$0xff] }
 0x3c2   : > { %v1666_v53 = vpop.eup %1665  ;;  %v1018_v55 = vadd.f32 %v1515_v52, %v890_v51  ;;  %v1012_v56 = vpop.f32.mrb[13].mxu0 }
 0x3c3   : > { %v1668_v57 = vpop.eup %1667  ;;  %v1013_v58 = vadd.f32 %v1012_v56, %v885_v54  ;;  %v1228_v51 = vpop.permute.xlu0 %1227 }
 0x3c4   : > { %1677 = vtanh.f32 %v1018_v55  ;;  %v1587_v59 = vpack.c.bf16 %v1666_v53, %v1668_v57  ;;  %v1304_v55 = vlaneseq }
 0x3c5   : > { %1679 = vtanh.f32 %v1013_v58 }
 0x3c6   : > { %v1670_v60 = vpop.eup %1669  ;;  %1588 = vmatprep.subr.bf16.mxu1 %v1587_v59  ;;  %v1305_v56 = vshrl.u32 %v1304_v55, 7 }
 0x3c7   : > { %v1672_v61 = vpop.eup %1671  ;;  %1590 = vmatpush3.bf16.msra.mxu1 %v1587_v59 }
 0x3c8   : > { %v1591_v62 = vpack.c.bf16 %v1670_v60, %v1672_v61  ;;  %vm1306_vm4 = vcmp.eq.s32.totalorder %v1305_v56, 4 }
 0x3ca   : > { %v1674_v63 = vpop.eup %1673  ;;  %1592 = vmatprep.subr.bf16.mxu1 %v1591_v62 }
 0x3cb   : > { %v1676_v0 = vpop.eup %1675  ;;  %1594 = vmatpush3.bf16.msra.mxu1 %v1591_v62 }
 0x3cc   : > { %v1595_v1 = vpack.c.bf16 %v1674_v63, %v1676_v0 }
 0x3ce   : > { %v1678_v2 = vpop.eup %1677  ;;  %1596 = vmatprep.subr.bf16.mxu1 %v1595_v1 }
 0x3cf   : > { %v1680_v3 = vpop.eup %1679  ;;  %1598 = vmatpush3.bf16.msra.mxu1 %v1595_v1 }
 0x3d0   : > { %v1599_v4 = vpack.c.bf16 %v1678_v2, %v1680_v3 }
 0x3d2   : > { %1600 = vmatprep.subr.bf16.mxu1 %v1599_v4 }
 0x3d3   : > { %1602 = vmatpush3.bf16.msra.mxu1 %v1599_v4 }
 0x3d6   : > { %1533 = vmatmul.mubr.msk.f32.vlgmr.msra.gmra.mrb[4].mxu1 %vm1085_vm2, %v1030_v5 }
 0x3d7   : > { %1535 = vmatprep.mubr.msk.f32.mxu1 %vm1085_vm2, %v1031_v6 }
 0x3da   : > { %1536 = vmatmul.mubr.msk.f32.gmra.mrb[6].mxu1 %vm1085_vm2, %v1032_v7 }
 0x3db   : > { %1538 = vmatprep.mubr.msk.f32.mxu1 %vm1085_vm2, %v1033_v8 }
 0x3de   : > { %1539 = vmatmul.mubr.msk.f32.gmra.mrb[8].mxu1 %vm1085_vm2, %v1034_v9 }
 0x3df   : > { %1541 = vmatprep.mubr.msk.f32.mxu1 %vm1085_vm2, %v1035_v10 }
 0x3e2   : > { %1542 = vmatmul.mubr.msk.f32.gmra.mrb[10].mxu1 %vm1085_vm2, %v1036_v11 }
 0x4a9   : > { %v1534_v17 = vpop.f32.mrb[4].mxu1 }
 0x4aa   : > { %v1182_v19 = vadd.f32 %v1534_v17, %v1053_v14  ;;  %v1176_v20 = vpop.f32.mrb[5].mxu1 }
 0x4ab   : > { %v1177_v21 = vadd.f32 %v1176_v20, %v1048_v15 }
 0x4ac   : > { %1681 = vtanh.f32 %v1182_v19 }
 0x4ad   : > { %1683 = vtanh.f32 %v1177_v21  ;;  %v1537_v22 = vpop.f32.mrb[6].mxu1 }
 0x4ae   : > { %v1192_v23 = vadd.f32 %v1537_v22, %v1063_v16  ;;  %v1186_v24 = vpop.f32.mrb[7].mxu1 }
 0x4af   : > { %v1187_v26 = vadd.f32 %v1186_v24, %v1058_v18 }
 0x4b0   : > { %1685 = vtanh.f32 %v1192_v23 }
 0x4b1   : > { %1687 = vtanh.f32 %v1187_v26  ;;  %v1540_v28 = vpop.f32.mrb[8].mxu1 }
 0x4b2   : > { %v1202_v29 = vadd.f32 %v1540_v28, %v1073_v25  ;;  %v1196_v30 = vpop.f32.mrb[9].mxu1 }
 0x4b3   : > { %v1197_v31 = vadd.f32 %v1196_v30, %v1068_v27 }
 0x4b4   : > { %1689 = vtanh.f32 %v1202_v29 }
 0x4b5   : > { %1691 = vtanh.f32 %v1197_v31  ;;  %v1543_v33 = vpop.f32.mrb[10].mxu1 }
 0x4b6   : > { %v1682_v34 = vpop.eup %1681  ;;  %v1212_v36 = vadd.f32 %v1543_v33, %v1083_v32  ;;  %v1206_v37 = vpop.f32.mrb[11].mxu1 }
 0x4b7   : > { %v1684_v38 = vpop.eup %1683  ;;  %v1207_v39 = vadd.f32 %v1206_v37, %v1078_v35 }
 0x4b8   : > { %1693 = vtanh.f32 %v1212_v36  ;;  %v1604_v40 = vpack.c.bf16 %v1682_v34, %v1684_v38 }
 0x4b9   : > { %1695 = vtanh.f32 %v1207_v39 }
 0x4ba   : > { %v1686_v41 = vpop.eup %1685  ;;  %1605 = vmatpush3.bf16.msra.mxu0 %v1604_v40 }
 0x4bb   : > { %v1688_v42 = vpop.eup %1687  ;;  %1606 = vmatprep.subr.bf16.mxu0 %v1724_v12 }
 0x4bc   : > { %v1607_v43 = vpack.c.bf16 %v1686_v41, %v1688_v42 }
 0x4be   : > { %v1690_v44 = vpop.eup %1689  ;;  %1608 = vmatpush3.bf16.msra.mxu0 %v1607_v43 }
 0x4bf   : > { %v1692_v45 = vpop.eup %1691  ;;  %1609 = vmatprep.subr.bf16.mxu0 %v1724_v12 }
 0x4c0   : > { %v1610_v46 = vpack.c.bf16 %v1690_v44, %v1692_v45 }
 0x4c2   : > { %v1694_v47 = vpop.eup %1693  ;;  %1611 = vmatpush3.bf16.msra.mxu0 %v1610_v46 }
 0x4c3   : > { %v1696_v48 = vpop.eup %1695  ;;  %1612 = vmatprep.subr.bf16.mxu0 %v1724_v12 }
 0x4c4   : > { %v1613_v49 = vpack.c.bf16 %v1694_v47, %v1696_v48 }
 0x4c6   : > { %1614 = vmatpush3.bf16.msra.mxu0 %v1613_v49 }
 0x4c9   : > { %1561 = vmatmul.mubr.msk.f32.vlgmr.msra.gmra.mrb[14].mxu0 %vm1085_vm2, %v1223_v50 }
 0x59c   : > { %v1299_v52 = vpop.f32.mrb[14].mxu0 }
 0x59d   : > { %v1300_v53 = vadd.f32 %v1299_v52, %v1228_v51  ;;  %v1562_v54 = vpop.f32.mrb[15].mxu0 }
 0x59f   : > { %1697 = vtanh.f32 %v1300_v53 }
 0x5a9   : > { %v1698_v57 = vpop.eup %1697 }
 0x5aa   : > { %v1307_v58 = vmul.f32 0.5, %v1698_v57 }
 0x5ac   : > { %v1308_v59 = vadd.f32 0.5, %v1307_v58 }
 0x5ae   : > { %v1311_v60 = vsel %vm1306_vm4, %v1308_v59, %v1698_v57 }
 0x5af   : > { %1312 = vst [vmem:[%s476_s18] sm:$0xff] %v1311_v60 }
 0x5b0 PF: > { %p20_p9 = scmp.ge.s32.totalorder %s1814_s29, 4   ;;  %s2054_s25 = smov %s1717_s26 }
 0x5b1   : > { %s2055_s26 = smov %s1823_s15  ;;  %s2056_s27 = smov %s1814_s29 }
 0x5b2   :  { %22 = sbr.rel (!%p20_p9) target bundleno = 2 (0x2), region = 145 }

</bundles_post_ra>
